<compile_context>
chip_gen: v6e
topology: v6e:2x2x1
jax: 0.10.0
libtpu: 0.0.40
codegen_flags: <defaults>
</compile_context>

<pallas_src>
import functools

import jax
import jax.numpy as jnp
import numpy as np
from jax import lax
from jax.experimental import pallas as pl
from jax.experimental.pallas import tpu as pltpu


def _bottleneck_kernel(x_ref, w1_ref, w2_ref, w3_ref, b1_ref, b2_ref, b3_ref,
                       mask_ref, o_ref, *, W):
    """Single invocation.  Activations are (channels, N*H*W) in VMEM.

    x_ref    : (Cin,  NHW)       w1_ref : (P, Cin)     b1_ref : (P, 1)
    w2_ref   : (9, P, P)         b2_ref : (P, 1)       mask_ref: (9, 1, NHW)
    w3_ref   : (Cout, P)         b3_ref : (Cout, 1)    o_ref  : (Cout, NHW)
    """
    NHW = x_ref.shape[-1]
    x = x_ref[...].astype(jnp.float32)                              # (Cin, NHW)

    # ---- conv1 (1x1, BN scale folded) + bias + relu: one MXU matmul --------
    h1 = jnp.dot(w1_ref[...], x, preferred_element_type=jnp.float32)  # (P, NHW)
    h1 = jnp.maximum(h1 + b1_ref[...], 0.0)

    # ---- conv2 (3x3 SAME, BN folded): 9 accumulating matmuls ---------------
    # tap_k[:, p] = h1[:, p + (dy-1)*W + (dx-1)]   (zero outside the image),
    # built with an XLU lane roll + a precomputed static boundary mask.
    # Center tap (k == 4) needs no roll and no mask.
    acc = jnp.dot(w2_ref[4], h1, preferred_element_type=jnp.float32)  # (P, NHW)
    for k in range(9):
        if k == 4:
            continue
        dy, dx = k // 3, k % 3
        d = (dy - 1) * W + (dx - 1)                  # flat lane offset
        # rolled[:, p] = h1[:, (p + d) mod NHW]; wraparound lanes are masked.
        rolled = pltpu.roll(h1, shift=(-d) % NHW, axis=1)
        tap = rolled * mask_ref[k]                   # (P, NHW) * (1, NHW)
        acc = acc + jnp.dot(w2_ref[k], tap, preferred_element_type=jnp.float32)
    h2 = jnp.maximum(acc + b2_ref[...], 0.0)

    # ---- conv3 (1x1, BN folded) + bias + identity residual + relu ----------
    h3 = jnp.dot(w3_ref[...], h2, preferred_element_type=jnp.float32)  # (Cout, NHW)
    o_ref[...] = jnp.maximum(h3 + b3_ref[...] + x, 0.0).astype(o_ref.dtype)


def bottleneck_pallas(x_nchw, w1, w2, w3, bn1, bn2, bn3, eps=1e-5):
    """x_nchw: (N, C, H, W) like PyTorch.  Conv weights in torch OIHW layout.

    bn* = (gamma, beta, running_mean, running_var), inference semantics.
    """
    N, Cin, H, W = x_nchw.shape
    P = w1.shape[0]                         # planes
    Cout = w3.shape[0]                      # planes * expansion
    assert Cout == Cin, "downsample=None requires in_planes == planes * 4"
    HW = H * W
    NHW = N * HW

    def fold(gamma, beta, mean, var):
        s = gamma / jnp.sqrt(var + eps)
        return s, beta - mean * s

    s1, b1 = fold(*bn1)
    s2, b2 = fold(*bn2)
    s3, b3 = fold(*bn3)

    # Fold BN scale into conv weights (exact refactor); kernel only adds bias.
    # Matmul orientation in-kernel:  (C_out, K) @ (K, N*H*W).
    w1t = w1[:, :, 0, 0] * s1[:, None]                                  # (P, Cin)
    # Per-tap conv2 weights, k = dy*3 + dx:  w2s[k][o, i] = w2[o, i, dy, dx]*s2[o]
    w2s = jnp.transpose(w2, (2, 3, 0, 1)).reshape(9, P, P) * s2[None, :, None]
    w3t = w3[:, :, 0, 0] * s3[:, None]                                  # (Cout, P)
    b1c = b1.reshape(P, 1)
    b2c = b2.reshape(P, 1)
    b3c = b3.reshape(Cout, 1)

    # Static per-image boundary masks for the 8 shifted taps (center = ones).
    # Positions are taken per image (lane % HW) so the batch fold stays correct.
    pos = np.arange(NHW) % HW
    yy = pos // W
    xx = pos % W
    masks_np = np.ones((9, 1, NHW), np.float32)
    for k in range(9):
        sy, sx = k // 3 - 1, k % 3 - 1
        if sy == 0 and sx == 0:
            continue
        valid = ((yy + sy >= 0) & (yy + sy < H) &
                 (xx + sx >= 0) & (xx + sx < W))
        masks_np[k, 0, :] = valid.astype(np.float32)
    masks = jnp.asarray(masks_np)

    # Channels on sublanes, batch*spatial on lanes (layout plumbing only).
    x_cl = jnp.transpose(x_nchw, (1, 0, 2, 3)).reshape(Cin, NHW)

    kernel = functools.partial(_bottleneck_kernel, W=W)

    def full_spec(a):                       # whole array, single grid step
        nd = a.ndim

        def imap(i):
            return (0,) * nd

        return pl.BlockSpec(a.shape, imap)

    inputs = (x_cl, w1t, w2s, w3t, b1c, b2c, b3c, masks)

    out = pl.pallas_call(
        kernel,
        out_shape=jax.ShapeDtypeStruct((Cout, NHW), x_nchw.dtype),
        grid_spec=pltpu.PrefetchScalarGridSpec(
            num_scalar_prefetch=0,
            grid=(1,),
            in_specs=[full_spec(a) for a in inputs],
            out_specs=pl.BlockSpec((Cout, NHW), lambda i: (0, 0)),
        ),
        compiler_params=pltpu.CompilerParams(
            dimension_semantics=("arbitrary",)),
    )(*inputs)

    return jnp.transpose(out.reshape(Cout, N, H, W), (1, 0, 2, 3))


def _ref_forward(x, w1, w2, w3, bn1, bn2, bn3, eps=1e-5):
    """Pure-JAX NCHW reference of the Bottleneck forward (eval-mode BN)."""
    dn = ("NCHW", "OIHW", "NCHW")

    def bn(y, p):
        g, b, m, v = p
        shp = (1, -1, 1, 1)
        scale = g.reshape(shp) / jnp.sqrt(v.reshape(shp) + eps)
        return (y - m.reshape(shp)) * scale + b.reshape(shp)

    out = lax.conv_general_dilated(x, w1, (1, 1), "VALID", dimension_numbers=dn)
    out = jax.nn.relu(bn(out, bn1))
    out = lax.conv_general_dilated(out, w2, (1, 1), ((1, 1), (1, 1)),
                                   dimension_numbers=dn)
    out = jax.nn.relu(bn(out, bn2))
    out = lax.conv_general_dilated(out, w3, (1, 1), "VALID", dimension_numbers=dn)
    out = bn(out, bn3)
    return jax.nn.relu(out + x)


if __name__ == "__main__":
    # Module config: planes=4, expansion=4 -> in_planes = 16, stride=1,
    # downsample=None (residual path is the identity).
    N, H, W = 2, 16, 16
    planes = 4
    in_planes = planes * 4          # = 16
    cout = planes * 4               # = 16

    key = jax.random.PRNGKey(0)
    ks = jax.random.split(key, 16)

    x = jax.random.normal(ks[0], (N, in_planes, H, W), jnp.float32)

    # Conv weights in PyTorch OIHW layout.
    w1 = jax.random.normal(ks[1], (planes, in_planes, 1, 1), jnp.float32) * 0.2
    w2 = jax.random.normal(ks[2], (planes, planes, 3, 3), jnp.float32) * 0.2
    w3 = jax.random.normal(ks[3], (cout, planes, 1, 1), jnp.float32) * 0.2

    def bn_params(kg, kb, km, kv, c):
        gamma = jax.random.uniform(kg, (c,), jnp.float32, 0.5, 1.5)
        beta = jax.random.normal(kb, (c,), jnp.float32) * 0.1
        mean = jax.random.normal(km, (c,), jnp.float32) * 0.1
        var = jax.random.uniform(kv, (c,), jnp.float32, 0.5, 1.5)
        return gamma, beta, mean, var

    bn1 = bn_params(ks[4], ks[5], ks[6], ks[7], planes)
    bn2 = bn_params(ks[8], ks[9], ks[10], ks[11], planes)
    bn3 = bn_params(ks[12], ks[13], ks[14], ks[15], cout)

    out = bottleneck_pallas(x, w1, w2, w3, bn1, bn2, bn3)
    out = jax.block_until_ready(out)

    ref = jax.block_until_ready(_ref_forward(x, w1, w2, w3, bn1, bn2, bn3))
    np.testing.assert_allclose(np.asarray(out), np.asarray(ref),
                               rtol=5e-4, atol=5e-4)

    print("KERNEL_OK")
</pallas_src>

<mosaic_0001>
module attributes {stable_mosaic.version = 11 : i64} {
  func.func @_bottleneck_kernel(%arg0: i32, %arg1: memref<16x512xf32, #tpu.memory_space<vmem>>, %arg2: memref<4x16xf32, #tpu.memory_space<vmem>>, %arg3: memref<9x4x4xf32, #tpu.memory_space<vmem>>, %arg4: memref<16x4xf32, #tpu.memory_space<vmem>>, %arg5: memref<4x1xf32, #tpu.memory_space<vmem>>, %arg6: memref<4x1xf32, #tpu.memory_space<vmem>>, %arg7: memref<16x1xf32, #tpu.memory_space<vmem>>, %arg8: memref<9x1x512xf32, #tpu.memory_space<vmem>>, %arg9: memref<16x512xf32, #tpu.memory_space<vmem>>) attributes {dimension_semantics = [#tpu.dimension_semantics<arbitrary>], iteration_bounds = array<i64: 1>, scalar_prefetch = 0 : i64, scratch_operands = 0 : i64, tpu.core_type = #tpu.core_type<tc>, window_params = [{pipeline_mode = #tpu.pipeline_mode<synchronous>, transform_indices = @transform_0, window_bounds = array<i64: 16, 512>}, {pipeline_mode = #tpu.pipeline_mode<synchronous>, transform_indices = @transform_1, window_bounds = array<i64: 4, 16>}, {pipeline_mode = #tpu.pipeline_mode<synchronous>, transform_indices = @transform_2, window_bounds = array<i64: 9, 4, 4>}, {pipeline_mode = #tpu.pipeline_mode<synchronous>, transform_indices = @transform_3, window_bounds = array<i64: 16, 4>}, {pipeline_mode = #tpu.pipeline_mode<synchronous>, transform_indices = @transform_4, window_bounds = array<i64: 4, 1>}, {pipeline_mode = #tpu.pipeline_mode<synchronous>, transform_indices = @transform_5, window_bounds = array<i64: 4, 1>}, {pipeline_mode = #tpu.pipeline_mode<synchronous>, transform_indices = @transform_6, window_bounds = array<i64: 16, 1>}, {pipeline_mode = #tpu.pipeline_mode<synchronous>, transform_indices = @transform_7, window_bounds = array<i64: 9, 1, 512>}, {pipeline_mode = #tpu.pipeline_mode<synchronous>, transform_indices = @transform_8, window_bounds = array<i64: 16, 512>}]} {
    %c0 = arith.constant 0 : index
    %c0_0 = arith.constant 0 : index
    %0 = vector.load %arg1[%c0, %c0_0] : memref<16x512xf32, #tpu.memory_space<vmem>>, vector<16x512xf32>
    %c0_1 = arith.constant 0 : index
    %c0_2 = arith.constant 0 : index
    %1 = vector.load %arg2[%c0_1, %c0_2] : memref<4x16xf32, #tpu.memory_space<vmem>>, vector<4x16xf32>
    %cst = arith.constant dense<0.000000e+00> : vector<4x512xf32>
    %2 = tpu.matmul %1, %0, %cst {dimension_numbers = #tpu.dot_dimension_numbers<[1], [0], [0], [1], [0, 0, 1, 1], [], []>} : vector<4x16xf32>, vector<16x512xf32>, vector<4x512xf32> -> vector<4x512xf32>
    %c0_3 = arith.constant 0 : index
    %c0_4 = arith.constant 0 : index
    %3 = vector.load %arg5[%c0_3, %c0_4] : memref<4x1xf32, #tpu.memory_space<vmem>>, vector<4x1xf32>
    %4 = vector.broadcast %3 : vector<4x1xf32> to vector<4x512xf32>
    %5 = arith.addf %2, %4 : vector<4x512xf32>
    %cst_5 = arith.constant 0.000000e+00 : f32
    %6 = vector.broadcast %cst_5 : f32 to vector<4x512xf32>
    %7 = arith.maximumf %5, %6 : vector<4x512xf32>
    %c4 = arith.constant 4 : index
    %c0_6 = arith.constant 0 : index
    %c0_7 = arith.constant 0 : index
    %8 = vector.load %arg3[%c4, %c0_6, %c0_7] : memref<9x4x4xf32, #tpu.memory_space<vmem>>, vector<1x4x4xf32>
    %9 = vector.shape_cast %8 : vector<1x4x4xf32> to vector<4x4xf32>
    %cst_8 = arith.constant dense<0.000000e+00> : vector<4x512xf32>
    %10 = tpu.matmul %9, %7, %cst_8 {dimension_numbers = #tpu.dot_dimension_numbers<[1], [0], [0], [1], [0, 0, 1, 1], [], []>} : vector<4x4xf32>, vector<4x512xf32>, vector<4x512xf32> -> vector<4x512xf32>
    %c17_i32 = arith.constant 17 : i32
    %11 = tpu.dynamic_rotate %7 by %c17_i32 dim 1 : vector<4x512xf32>, i32 -> vector<4x512xf32>
    %c0_9 = arith.constant 0 : index
    %c0_10 = arith.constant 0 : index
    %c0_11 = arith.constant 0 : index
    %12 = vector.load %arg8[%c0_9, %c0_10, %c0_11] : memref<9x1x512xf32, #tpu.memory_space<vmem>>, vector<1x1x512xf32>
    %13 = vector.shape_cast %12 : vector<1x1x512xf32> to vector<1x512xf32>
    %14 = vector.broadcast %13 : vector<1x512xf32> to vector<4x512xf32>
    %15 = arith.mulf %11, %14 : vector<4x512xf32>
    %c0_12 = arith.constant 0 : index
    %c0_13 = arith.constant 0 : index
    %c0_14 = arith.constant 0 : index
    %16 = vector.load %arg3[%c0_12, %c0_13, %c0_14] : memref<9x4x4xf32, #tpu.memory_space<vmem>>, vector<1x4x4xf32>
    %17 = vector.shape_cast %16 : vector<1x4x4xf32> to vector<4x4xf32>
    %cst_15 = arith.constant dense<0.000000e+00> : vector<4x512xf32>
    %18 = tpu.matmul %17, %15, %cst_15 {dimension_numbers = #tpu.dot_dimension_numbers<[1], [0], [0], [1], [0, 0, 1, 1], [], []>} : vector<4x4xf32>, vector<4x512xf32>, vector<4x512xf32> -> vector<4x512xf32>
    %19 = arith.addf %10, %18 : vector<4x512xf32>
    %c16_i32 = arith.constant 16 : i32
    %20 = tpu.dynamic_rotate %7 by %c16_i32 dim 1 : vector<4x512xf32>, i32 -> vector<4x512xf32>
    %c1 = arith.constant 1 : index
    %c0_16 = arith.constant 0 : index
    %c0_17 = arith.constant 0 : index
    %21 = vector.load %arg8[%c1, %c0_16, %c0_17] : memref<9x1x512xf32, #tpu.memory_space<vmem>>, vector<1x1x512xf32>
    %22 = vector.shape_cast %21 : vector<1x1x512xf32> to vector<1x512xf32>
    %23 = vector.broadcast %22 : vector<1x512xf32> to vector<4x512xf32>
    %24 = arith.mulf %20, %23 : vector<4x512xf32>
    %c1_18 = arith.constant 1 : index
    %c0_19 = arith.constant 0 : index
    %c0_20 = arith.constant 0 : index
    %25 = vector.load %arg3[%c1_18, %c0_19, %c0_20] : memref<9x4x4xf32, #tpu.memory_space<vmem>>, vector<1x4x4xf32>
    %26 = vector.shape_cast %25 : vector<1x4x4xf32> to vector<4x4xf32>
    %cst_21 = arith.constant dense<0.000000e+00> : vector<4x512xf32>
    %27 = tpu.matmul %26, %24, %cst_21 {dimension_numbers = #tpu.dot_dimension_numbers<[1], [0], [0], [1], [0, 0, 1, 1], [], []>} : vector<4x4xf32>, vector<4x512xf32>, vector<4x512xf32> -> vector<4x512xf32>
    %28 = arith.addf %19, %27 : vector<4x512xf32>
    %c15_i32 = arith.constant 15 : i32
    %29 = tpu.dynamic_rotate %7 by %c15_i32 dim 1 : vector<4x512xf32>, i32 -> vector<4x512xf32>
    %c2 = arith.constant 2 : index
    %c0_22 = arith.constant 0 : index
    %c0_23 = arith.constant 0 : index
    %30 = vector.load %arg8[%c2, %c0_22, %c0_23] : memref<9x1x512xf32, #tpu.memory_space<vmem>>, vector<1x1x512xf32>
    %31 = vector.shape_cast %30 : vector<1x1x512xf32> to vector<1x512xf32>
    %32 = vector.broadcast %31 : vector<1x512xf32> to vector<4x512xf32>
    %33 = arith.mulf %29, %32 : vector<4x512xf32>
    %c2_24 = arith.constant 2 : index
    %c0_25 = arith.constant 0 : index
    %c0_26 = arith.constant 0 : index
    %34 = vector.load %arg3[%c2_24, %c0_25, %c0_26] : memref<9x4x4xf32, #tpu.memory_space<vmem>>, vector<1x4x4xf32>
    %35 = vector.shape_cast %34 : vector<1x4x4xf32> to vector<4x4xf32>
    %cst_27 = arith.constant dense<0.000000e+00> : vector<4x512xf32>
    %36 = tpu.matmul %35, %33, %cst_27 {dimension_numbers = #tpu.dot_dimension_numbers<[1], [0], [0], [1], [0, 0, 1, 1], [], []>} : vector<4x4xf32>, vector<4x512xf32>, vector<4x512xf32> -> vector<4x512xf32>
    %37 = arith.addf %28, %36 : vector<4x512xf32>
    %c1_i32 = arith.constant 1 : i32
    %38 = tpu.dynamic_rotate %7 by %c1_i32 dim 1 : vector<4x512xf32>, i32 -> vector<4x512xf32>
    %c3 = arith.constant 3 : index
    %c0_28 = arith.constant 0 : index
    %c0_29 = arith.constant 0 : index
    %39 = vector.load %arg8[%c3, %c0_28, %c0_29] : memref<9x1x512xf32, #tpu.memory_space<vmem>>, vector<1x1x512xf32>
    %40 = vector.shape_cast %39 : vector<1x1x512xf32> to vector<1x512xf32>
    %41 = vector.broadcast %40 : vector<1x512xf32> to vector<4x512xf32>
    %42 = arith.mulf %38, %41 : vector<4x512xf32>
    %c3_30 = arith.constant 3 : index
    %c0_31 = arith.constant 0 : index
    %c0_32 = arith.constant 0 : index
    %43 = vector.load %arg3[%c3_30, %c0_31, %c0_32] : memref<9x4x4xf32, #tpu.memory_space<vmem>>, vector<1x4x4xf32>
    %44 = vector.shape_cast %43 : vector<1x4x4xf32> to vector<4x4xf32>
    %cst_33 = arith.constant dense<0.000000e+00> : vector<4x512xf32>
    %45 = tpu.matmul %44, %42, %cst_33 {dimension_numbers = #tpu.dot_dimension_numbers<[1], [0], [0], [1], [0, 0, 1, 1], [], []>} : vector<4x4xf32>, vector<4x512xf32>, vector<4x512xf32> -> vector<4x512xf32>
    %46 = arith.addf %37, %45 : vector<4x512xf32>
    %c511_i32 = arith.constant 511 : i32
    %47 = tpu.dynamic_rotate %7 by %c511_i32 dim 1 : vector<4x512xf32>, i32 -> vector<4x512xf32>
    %c5 = arith.constant 5 : index
    %c0_34 = arith.constant 0 : index
    %c0_35 = arith.constant 0 : index
    %48 = vector.load %arg8[%c5, %c0_34, %c0_35] : memref<9x1x512xf32, #tpu.memory_space<vmem>>, vector<1x1x512xf32>
    %49 = vector.shape_cast %48 : vector<1x1x512xf32> to vector<1x512xf32>
    %50 = vector.broadcast %49 : vector<1x512xf32> to vector<4x512xf32>
    %51 = arith.mulf %47, %50 : vector<4x512xf32>
    %c5_36 = arith.constant 5 : index
    %c0_37 = arith.constant 0 : index
    %c0_38 = arith.constant 0 : index
    %52 = vector.load %arg3[%c5_36, %c0_37, %c0_38] : memref<9x4x4xf32, #tpu.memory_space<vmem>>, vector<1x4x4xf32>
    %53 = vector.shape_cast %52 : vector<1x4x4xf32> to vector<4x4xf32>
    %cst_39 = arith.constant dense<0.000000e+00> : vector<4x512xf32>
    %54 = tpu.matmul %53, %51, %cst_39 {dimension_numbers = #tpu.dot_dimension_numbers<[1], [0], [0], [1], [0, 0, 1, 1], [], []>} : vector<4x4xf32>, vector<4x512xf32>, vector<4x512xf32> -> vector<4x512xf32>
    %55 = arith.addf %46, %54 : vector<4x512xf32>
    %c497_i32 = arith.constant 497 : i32
    %56 = tpu.dynamic_rotate %7 by %c497_i32 dim 1 : vector<4x512xf32>, i32 -> vector<4x512xf32>
    %c6 = arith.constant 6 : index
    %c0_40 = arith.constant 0 : index
    %c0_41 = arith.constant 0 : index
    %57 = vector.load %arg8[%c6, %c0_40, %c0_41] : memref<9x1x512xf32, #tpu.memory_space<vmem>>, vector<1x1x512xf32>
    %58 = vector.shape_cast %57 : vector<1x1x512xf32> to vector<1x512xf32>
    %59 = vector.broadcast %58 : vector<1x512xf32> to vector<4x512xf32>
    %60 = arith.mulf %56, %59 : vector<4x512xf32>
    %c6_42 = arith.constant 6 : index
    %c0_43 = arith.constant 0 : index
    %c0_44 = arith.constant 0 : index
    %61 = vector.load %arg3[%c6_42, %c0_43, %c0_44] : memref<9x4x4xf32, #tpu.memory_space<vmem>>, vector<1x4x4xf32>
    %62 = vector.shape_cast %61 : vector<1x4x4xf32> to vector<4x4xf32>
    %cst_45 = arith.constant dense<0.000000e+00> : vector<4x512xf32>
    %63 = tpu.matmul %62, %60, %cst_45 {dimension_numbers = #tpu.dot_dimension_numbers<[1], [0], [0], [1], [0, 0, 1, 1], [], []>} : vector<4x4xf32>, vector<4x512xf32>, vector<4x512xf32> -> vector<4x512xf32>
    %64 = arith.addf %55, %63 : vector<4x512xf32>
    %c496_i32 = arith.constant 496 : i32
    %65 = tpu.dynamic_rotate %7 by %c496_i32 dim 1 : vector<4x512xf32>, i32 -> vector<4x512xf32>
    %c7 = arith.constant 7 : index
    %c0_46 = arith.constant 0 : index
    %c0_47 = arith.constant 0 : index
    %66 = vector.load %arg8[%c7, %c0_46, %c0_47] : memref<9x1x512xf32, #tpu.memory_space<vmem>>, vector<1x1x512xf32>
    %67 = vector.shape_cast %66 : vector<1x1x512xf32> to vector<1x512xf32>
    %68 = vector.broadcast %67 : vector<1x512xf32> to vector<4x512xf32>
    %69 = arith.mulf %65, %68 : vector<4x512xf32>
    %c7_48 = arith.constant 7 : index
    %c0_49 = arith.constant 0 : index
    %c0_50 = arith.constant 0 : index
    %70 = vector.load %arg3[%c7_48, %c0_49, %c0_50] : memref<9x4x4xf32, #tpu.memory_space<vmem>>, vector<1x4x4xf32>
    %71 = vector.shape_cast %70 : vector<1x4x4xf32> to vector<4x4xf32>
    %cst_51 = arith.constant dense<0.000000e+00> : vector<4x512xf32>
    %72 = tpu.matmul %71, %69, %cst_51 {dimension_numbers = #tpu.dot_dimension_numbers<[1], [0], [0], [1], [0, 0, 1, 1], [], []>} : vector<4x4xf32>, vector<4x512xf32>, vector<4x512xf32> -> vector<4x512xf32>
    %73 = arith.addf %64, %72 : vector<4x512xf32>
    %c495_i32 = arith.constant 495 : i32
    %74 = tpu.dynamic_rotate %7 by %c495_i32 dim 1 : vector<4x512xf32>, i32 -> vector<4x512xf32>
    %c8 = arith.constant 8 : index
    %c0_52 = arith.constant 0 : index
    %c0_53 = arith.constant 0 : index
    %75 = vector.load %arg8[%c8, %c0_52, %c0_53] : memref<9x1x512xf32, #tpu.memory_space<vmem>>, vector<1x1x512xf32>
    %76 = vector.shape_cast %75 : vector<1x1x512xf32> to vector<1x512xf32>
    %77 = vector.broadcast %76 : vector<1x512xf32> to vector<4x512xf32>
    %78 = arith.mulf %74, %77 : vector<4x512xf32>
    %c8_54 = arith.constant 8 : index
    %c0_55 = arith.constant 0 : index
    %c0_56 = arith.constant 0 : index
    %79 = vector.load %arg3[%c8_54, %c0_55, %c0_56] : memref<9x4x4xf32, #tpu.memory_space<vmem>>, vector<1x4x4xf32>
    %80 = vector.shape_cast %79 : vector<1x4x4xf32> to vector<4x4xf32>
    %cst_57 = arith.constant dense<0.000000e+00> : vector<4x512xf32>
    %81 = tpu.matmul %80, %78, %cst_57 {dimension_numbers = #tpu.dot_dimension_numbers<[1], [0], [0], [1], [0, 0, 1, 1], [], []>} : vector<4x4xf32>, vector<4x512xf32>, vector<4x512xf32> -> vector<4x512xf32>
    %82 = arith.addf %73, %81 : vector<4x512xf32>
    %c0_58 = arith.constant 0 : index
    %c0_59 = arith.constant 0 : index
    %83 = vector.load %arg6[%c0_58, %c0_59] : memref<4x1xf32, #tpu.memory_space<vmem>>, vector<4x1xf32>
    %84 = vector.broadcast %83 : vector<4x1xf32> to vector<4x512xf32>
    %85 = arith.addf %82, %84 : vector<4x512xf32>
    %cst_60 = arith.constant 0.000000e+00 : f32
    %86 = vector.broadcast %cst_60 : f32 to vector<4x512xf32>
    %87 = arith.maximumf %85, %86 : vector<4x512xf32>
    %c0_61 = arith.constant 0 : index
    %c0_62 = arith.constant 0 : index
    %88 = vector.load %arg4[%c0_61, %c0_62] : memref<16x4xf32, #tpu.memory_space<vmem>>, vector<16x4xf32>
    %cst_63 = arith.constant dense<0.000000e+00> : vector<16x512xf32>
    %89 = tpu.matmul %88, %87, %cst_63 {dimension_numbers = #tpu.dot_dimension_numbers<[1], [0], [0], [1], [0, 0, 1, 1], [], []>} : vector<16x4xf32>, vector<4x512xf32>, vector<16x512xf32> -> vector<16x512xf32>
    %c0_64 = arith.constant 0 : index
    %c0_65 = arith.constant 0 : index
    %90 = vector.load %arg7[%c0_64, %c0_65] : memref<16x1xf32, #tpu.memory_space<vmem>>, vector<16x1xf32>
    %91 = vector.broadcast %90 : vector<16x1xf32> to vector<16x512xf32>
    %92 = arith.addf %89, %91 : vector<16x512xf32>
    %93 = arith.addf %92, %0 : vector<16x512xf32>
    %cst_66 = arith.constant 0.000000e+00 : f32
    %94 = vector.broadcast %cst_66 : f32 to vector<16x512xf32>
    %95 = arith.maximumf %93, %94 : vector<16x512xf32>
    %c0_67 = arith.constant 0 : index
    %c0_68 = arith.constant 0 : index
    %96 = vector.load %arg9[%c0_67, %c0_68] : memref<16x512xf32, #tpu.memory_space<vmem>>, vector<16x512xf32>
    tpu.vector_store %arg9[%c0_67, %c0_68], %95 {strides = array<i32>} : memref<16x512xf32, #tpu.memory_space<vmem>>, vector<16x512xf32>,
    return
  }
  func.func @transform_0(%arg0: i32) -> (i32, i32) {
    %c0_i32 = arith.constant 0 : i32
    %c0_i32_0 = arith.constant 0 : i32
    %c0_i32_1 = arith.constant 0 : i32
    return %c0_i32, %c0_i32_0 : i32, i32
  }
  func.func @transform_1(%arg0: i32) -> (i32, i32) {
    %c0_i32 = arith.constant 0 : i32
    %c0_i32_0 = arith.constant 0 : i32
    %c0_i32_1 = arith.constant 0 : i32
    return %c0_i32, %c0_i32_0 : i32, i32
  }
  func.func @transform_2(%arg0: i32) -> (i32, i32, i32) {
    %c0_i32 = arith.constant 0 : i32
    %c0_i32_0 = arith.constant 0 : i32
    %c0_i32_1 = arith.constant 0 : i32
    %c0_i32_2 = arith.constant 0 : i32
    return %c0_i32, %c0_i32_0, %c0_i32_1 : i32, i32, i32
  }
  func.func @transform_3(%arg0: i32) -> (i32, i32) {
    %c0_i32 = arith.constant 0 : i32
    %c0_i32_0 = arith.constant 0 : i32
    %c0_i32_1 = arith.constant 0 : i32
    return %c0_i32, %c0_i32_0 : i32, i32
  }
  func.func @transform_4(%arg0: i32) -> (i32, i32) {
    %c0_i32 = arith.constant 0 : i32
    %c0_i32_0 = arith.constant 0 : i32
    %c0_i32_1 = arith.constant 0 : i32
    return %c0_i32, %c0_i32_0 : i32, i32
  }
  func.func @transform_5(%arg0: i32) -> (i32, i32) {
    %c0_i32 = arith.constant 0 : i32
    %c0_i32_0 = arith.constant 0 : i32
    %c0_i32_1 = arith.constant 0 : i32
    return %c0_i32, %c0_i32_0 : i32, i32
  }
  func.func @transform_6(%arg0: i32) -> (i32, i32) {
    %c0_i32 = arith.constant 0 : i32
    %c0_i32_0 = arith.constant 0 : i32
    %c0_i32_1 = arith.constant 0 : i32
    return %c0_i32, %c0_i32_0 : i32, i32
  }
  func.func @transform_7(%arg0: i32) -> (i32, i32, i32) {
    %c0_i32 = arith.constant 0 : i32
    %c0_i32_0 = arith.constant 0 : i32
    %c0_i32_1 = arith.constant 0 : i32
    %c0_i32_2 = arith.constant 0 : i32
    return %c0_i32, %c0_i32_0, %c0_i32_1 : i32, i32, i32
  }
  func.func @transform_8(%arg0: i32) -> (i32, i32) {
    %c0_i32 = arith.constant 0 : i32
    %c0_i32_0 = arith.constant 0 : i32
    %c0_i32_1 = arith.constant 0 : i32
    return %c0_i32, %c0_i32_0 : i32, i32
  }
}

</mosaic_0001>

<bundles_post_ra>
// kernel: tpu_custom_call.1
= control target key start
LH: loop header
LB: loop body
LE: loop exit
PB: predicated region body
PF: predicated region fallthrough
CT: control target
= control target key end

     0   :  { %13 = vsyncpa [#allocation3], 0  ;;  %s2858_s0 = inlined_call_operand.vmem [shape: f32[16,512], index: 0, kind: input, shape index: {}]   ;;  %s2859_s1 = inlined_call_operand.hbm [shape: f32[4,16], index: 1, kind: input, shape index: {}]   ;;  %s2860_s2 = inlined_call_operand.vmem [shape: f32[9,4,4], index: 2, kind: input, shape index: {}]   ;;  %s2861_s3 = inlined_call_operand.vmem [shape: f32[16,4], index: 3, kind: input, shape index: {}]   ;;  %s2862_s4 = inlined_call_operand.vmem [shape: f32[4,1], index: 4, kind: input, shape index: {}]   ;;  %s2863_s5 = inlined_call_operand.vmem [shape: f32[4,1], index: 5, kind: input, shape index: {}]   ;;  %s2864_s6 = inlined_call_operand.vmem [shape: f32[16,1], index: 6, kind: input, shape index: {}]   ;;  %s2865_s7 = inlined_call_operand.vmem [shape: f32[9,1,512], index: 7, kind: input, shape index: {}]   ;;  %s2866_s8 = inlined_call_operand.hbm [shape: f32[16,512], index: 8, kind: output, shape index: {}]  }
   0x1   :  { %14 = vsyncpa [#allocation4], 0  ;;  %s2368_s27 = smov [#allocation2]  }
   0x2   :  { %s23_s28 = sshll.u32 %s2368_s27, 4  ;;  %s24_s28 = int_to_ptr.vmem [resolvable:$true] %s23_s28 }
   0x3   :  { %s2332_s29 = scalar_lea.vmem %s24_s28, 64  ;;  %p2337_p1 = scmp.lt.s32.totalorder %s24_s28, %s24_s28 }
   0x4   :  { %p2333_p0 = scmp.ne.s32.totalorder %s24_s28, %s2332_s29  ;;  %p2338_p2 = scmp.lt.s32.totalorder %s2332_s29, %s2332_s29 }
   0x6   :  { %p2339_p3 = por %p2338_p2, %p2337_p1 }
   0x8   :  { %p2340_p4 = pnand %p2339_p3, %p2333_p0 }
   0xa   :  { %2343 = shalt.err (!%p2340_p4)
}
   0xb   :  { %26 = dma.hbm_to_vmem [thread:$0]  %s2859_s1, 64, %s24_s28, [#allocation3]  }
   0xc   :  { %2364 = dma.done.wait [#allocation3], 64  }
   0xd   :  { %2365 = vsyncadd [#allocation3], 4294967232  ;;  %v2369_v0 = vmov 0.0   ;;  %v2370_v1 = vmov 0   ;;  %v2435_v2 = vld [vmem:[%s2858_s0 + $0x28] sm:$0xff]  ;;  %v2440_v3 = vld [vmem:[%s2858_s0 + $0x38] sm:$0xff]  ;;  %v217_v28 = vlaneseq }
   0xe   :  { %125 = vmatprep.mubr.f32.mxu0 %v2369_v0  ;;  %196 = vmatprep.mubr.f32.mxu1 %v2369_v0  ;;  %v2445_v4 = vld [vmem:[%s2858_s0 + $0x20] sm:$0xff]  ;;  %v2452_v5 = vld [vmem:[%s2858_s0 + $0x30] sm:$0xff]  ;;  %v2457_v6 = vld [vmem:[%s2858_s0 + $0x8] sm:$0xff]  ;;  %vm57_vm0 = vcmask 130048   ;;  %s2373_s27 = smov 15   ;;  %s2374_s28 = smov 1  }
   0xf   :  { %2322 = vset.pattern.permute.xlu0 %v2370_v1  ;;  %2323 = vset.pattern.permute.xlu1 %v2370_v1  ;;  %v2462_v7 = vld [vmem:[%s2858_s0 + $0x18] sm:$0xff]  ;;  %v2469_v8 = vld [vmem:[%s2858_s0] sm:$0xff]  ;;  %v2474_v9 = vld [vmem:[%s2858_s0 + $0x10] sm:$0xff]  ;;  %s2371_s0 = smov 17   ;;  %s2375_s29 = smov 127   ;;  %v227_v29 = vshrl.u32 %v217_v28, 7 }
  0x10   :  { %89 = vmatprep.subr.mxu0 %v2435_v2  ;;  %160 = vmatprep.subr.mxu1 %v2440_v3  ;;  %v50_v10 = vld [vmem:[#allocation2] sm:$0xf]  ;;  %s2376_s30 = smov 113   ;;  %s2377_s9 = smov 112   ;;  %v2005_v27 = vld [vmem:[%s2864_s6 + $0x8] sm:$0xff]  ;;  %v2534_v30 = vand.u32 127, %v217_v28 }
  0x11   :  { %90 = vmatpush1.msra.mxu0 %v2445_v4  ;;  %161 = vmatpush1.msra.mxu1 %v2452_v5  ;;  %v51_v11 = vld [vmem:[%s2862_s4] sm:$0xf]  ;;  %s2372_s4 = smov 16   ;;  %s2378_s10 = smov 111   ;;  %v2536_v31 = vsub.s32 3, %v227_v29  ;;  %vm255_vm2 = vcmask 1043456  }
  0x12   :  { %91 = vmatprep.subr.mxu0 %v2457_v6  ;;  %162 = vmatprep.subr.mxu1 %v2462_v7  ;;  %v2004_v25 = vld [vmem:[%s2864_s6] sm:$0xff]  ;;  %vm219_vm1 = vcmp.lt.s32.totalorder %v2534_v30, 17  ;;  %v2556_v48 = vsub.s32 0, %v227_v29  ;;  %v2558_v49 = vsub.s32 1, %v227_v29  ;;  %v2560_v50 = vsub.s32 2, %v227_v29 }
  0x13   :  { %92 = vmatpush1.msra.mxu0 %v2469_v8  ;;  %163 = vmatpush1.msra.mxu1 %v2474_v9  ;;  %v1988_v26 = vld [vmem:[%s2863_s5] sm:$0xf]  ;;  %v2244_v57 = vld [vmem:[%s2865_s7 + $0x4] sm:$0xf]  ;;  %vm575_vm3 = vcmp.lt.s32.totalorder %v2534_v30, 16  ;;  %vm251_vm4 = vcmask 31744  }
  0x14   :  { %2229 = vmatmul.mubr.msk.f32.vlgmr.msra.gmra.mxu0 %vm57_vm0, %v50_v10  ;;  %2230 = vmatmul.mubr.msk.f32.vlgmr.msra.gmra.mxu1 %vm57_vm0, %v50_v10  ;;  %v224_v32 = vld [vmem:[%s2865_s7] sm:$0xf]  ;;  %v598_v62 = vrot.slane %v2244_v57, %v2536_v31  ;;  %v2585_v63 = vld [vmem:[%s2865_s7 + $0x8] sm:$0xf]  ;;  %vm778_vm5 = vcmp.lt.s32.totalorder %v2534_v30, 15  ;;  %vm981_vm6 = vcmp.lt.s32.totalorder %v2534_v30, 1 }
  0x15   :  { %54 = vperm.xlu0 %2322, %v51_v11   ;;  %403 = vmatprep.mubr.f32.mxu1 %v2369_v0  ;;  %v241_v35 = vrot.slane %v224_v32, %v2536_v31  ;;  %v233_v53 = vrot.slane %v224_v32, %v2558_v49  ;;  %v237_v54 = vrot.slane %v224_v32, %v2560_v50  ;;  %v250_v11 = vld [vmem:[%s2860_s2] sm:$0xf]  ;;  %v2615_v28 = vld [vmem:[%s2865_s7 + $0xc] sm:$0xf]  ;;  %vm1184_vm7 = vcmp.lt.s32.totalorder %v2534_v30, 127 }
  0x16   :  { %332 = vmatprep.mubr.f32.mxu0 %v2369_v0  ;;  %v229_v55 = vrot.slane %v224_v32, %v2556_v48  ;;  %vm1387_vm8 = vcmp.lt.s32.totalorder %v2534_v30, 113  ;;  %vm1590_vm9 = vcmp.lt.s32.totalorder %v2534_v30, 112  ;;  %vm1793_vm10 = vcmp.lt.s32.totalorder %v2534_v30, 111  ;;  %v2293_v30 = vld [vmem:[%s2860_s2 + $0x20] sm:$0xf] }
  0x90   :  { %v55_v12 = vpop.permute.xlu0 %54 }
  0xd4   :  { %v127_v13 = vpop.f32.mrf.mxu0  ;;  %v198_v14 = vpop.f32.mrf.mxu1 }
  0xd5   :  { %v128_v15 = vadd.f32 %v127_v13, %v55_v12  ;;  %v199_v16 = vadd.f32 %v198_v14, %v55_v12  ;;  %v590_v13 = vrot.slane %v2244_v57, %v2558_v49 }
  0xd6   :  { %v200_v17 = vpop.f32.mrf.mxu1  ;;  %v129_v21 = vpop.f32.mrf.mxu0 }
  0xd7   :  { %v2485_v18 = vmax.f32 %v128_v15, 0.0  ;;  %v2487_v19 = vmax.f32 %v199_v16, 0.0  ;;  %v201_v20 = vadd.f32 %v200_v17, %v55_v12  ;;  %v130_v22 = vadd.f32 %v129_v21, %v55_v12 }
  0xd8   :  { %v586_v21 = vrot.slane %v2244_v57, %v2556_v48 }
  0xd9   :  { %213 = vrot.lane.b32.xlu1 %v2487_v19, %s2371_s0  ;;  %209 = vrot.lane.b32.xlu0 %v2485_v18, %s2371_s0  ;;  %v2491_v23 = vmax.f32 %v201_v20, 0.0  ;;  %v2495_v24 = vmax.f32 %v130_v22, 0.0  ;;  %v594_v20 = vrot.slane %v2244_v57, %v2560_v50  ;;  %v793_v22 = vrot.slane %v2585_v63, %v2558_v49 }
  0xdd   :  { %567 = vrot.lane.b32.xlu1 %v2485_v18, %s2372_s4  ;;  %215 = vrot.lane.b32.xlu0 %v2491_v23, %s2371_s0 }
  0xe1   :  { %571 = vrot.lane.b32.xlu1 %v2487_v19, %s2372_s4  ;;  %569 = vrot.lane.b32.xlu0 %v2495_v24, %s2372_s4 }
  0xe5   :  { %770 = vrot.lane.b32.xlu1 %v2485_v18, %s2373_s27  ;;  %573 = vrot.lane.b32.xlu0 %v2491_v23, %s2372_s4 }
  0xe9   :  { %774 = vrot.lane.b32.xlu1 %v2487_v19, %s2373_s27  ;;  %772 = vrot.lane.b32.xlu0 %v2495_v24, %s2373_s27 }
  0xed   :  { %973 = vrot.lane.b32.xlu1 %v2485_v18, %s2374_s28  ;;  %776 = vrot.lane.b32.xlu0 %v2491_v23, %s2373_s27 }
  0xf1   :  { %977 = vrot.lane.b32.xlu1 %v2487_v19, %s2374_s28  ;;  %975 = vrot.lane.b32.xlu0 %v2495_v24, %s2374_s28 }
  0xf5   :  { %211 = vrot.lane.b32.xlu1 %v2495_v24, %s2371_s0  ;;  %979 = vrot.lane.b32.xlu0 %v2491_v23, %s2374_s28 }
  0xf9   :  { %1176 = vrot.lane.b32.xlu1 %v2485_v18, %s2375_s29  ;;  %1178 = vrot.lane.b32.xlu0 %v2495_v24, %s2375_s29 }
  0xfd   :  { %1180 = vrot.lane.b32.xlu1 %v2487_v19, %s2375_s29  ;;  %1182 = vrot.lane.b32.xlu0 %v2491_v23, %s2375_s29 }
 0x101   :  { %1379 = vrot.lane.b32.xlu1 %v2485_v18, %s2376_s30  ;;  %1381 = vrot.lane.b32.xlu0 %v2495_v24, %s2376_s30 }
 0x105   :  { %1383 = vrot.lane.b32.xlu1 %v2487_v19, %s2376_s30  ;;  %1385 = vrot.lane.b32.xlu0 %v2491_v23, %s2376_s30 }
 0x109   :  { %1582 = vrot.lane.b32.xlu1 %v2485_v18, %s2377_s9  ;;  %1584 = vrot.lane.b32.xlu0 %v2495_v24, %s2377_s9 }
 0x10d   :  { %1586 = vrot.lane.b32.xlu1 %v2487_v19, %s2377_s9  ;;  %1588 = vrot.lane.b32.xlu0 %v2491_v23, %s2377_s9 }
 0x111   :  { %1785 = vrot.lane.b32.xlu1 %v2485_v18, %s2378_s10  ;;  %1787 = vrot.lane.b32.xlu0 %v2495_v24, %s2378_s10 }
 0x115   :  { %1789 = vrot.lane.b32.xlu1 %v2487_v19, %s2378_s10  ;;  %1791 = vrot.lane.b32.xlu0 %v2491_v23, %s2378_s10 }
 0x119   :  { %2008 = vperm.xlu0 %2322, %v2004_v25   ;;  %1991 = vperm.xlu1 %2323, %v1988_v26  }
 0x11d   :  { %2013 = vperm.xlu1 %2323, %v2005_v27   ;;  %v801_v27 = vrot.slane %v2585_v63, %v2536_v31 }
 0x14b   :  { %v214_v33 = vpop.permute.xlu1 %213  ;;  %v210_v34 = vpop.permute.xlu0 %209 }
 0x14f   :  { %v568_v36 = vpop.permute.xlu1 %567  ;;  %v216_v37 = vpop.permute.xlu0 %215 }
 0x150   :  { %v220_v38 = vsel %vm219_vm1, %v214_v33, %v216_v37  ;;  %v223_v56 = vsel %vm219_vm1, %v216_v37, %v210_v34 }
 0x151   :  { %v249_v39 = vmul.f32 %v241_v35, %v220_v38  ;;  %v246_v12 = vmul.f32 %v229_v55, %v223_v56  ;;  %v996_v38 = vrot.slane %v2615_v28, %v2558_v49  ;;  %v2268_v55 = vld [vmem:[%s2865_s7 + $0x14] sm:$0xf] }
 0x153   :  { %v572_v40 = vpop.permute.xlu1 %571  ;;  %2235 = vmatprep.subr.msk.mxu1 %vm255_vm2, %v249_v39  ;;  %v570_v41 = vpop.permute.xlu0 %569  ;;  %v1004_v39 = vrot.slane %v2615_v28, %v2536_v31 }
 0x154   :  { %v578_v15 = vsel %vm575_vm3, %v568_v36, %v570_v41  ;;  %v577_v25 = vsel %vm575_vm3, %v570_v41, %v572_v40 }
 0x155   :  { %v604_v29 = vmul.f32 %v590_v13, %v578_v15  ;;  %v605_v37 = vmul.f32 %v594_v20, %v577_v25 }
 0x157   :  { %v2546_v42 = vpop.permute.xlu1 %770  ;;  %v574_v43 = vpop.permute.xlu0 %573 }
 0x158   :  { %v576_v14 = vsel %vm575_vm3, %v572_v40, %v574_v43  ;;  %v579_v32 = vsel %vm575_vm3, %v574_v43, %v568_v36  ;;  %v789_v36 = vrot.slane %v2585_v63, %v2556_v48 }
 0x159   :  { %v606_v26 = vmul.f32 %v598_v62, %v576_v14  ;;  %v603_v40 = vmul.f32 %v586_v21, %v579_v32 }
 0x15b   :  { %v2548_v44 = vpop.permute.xlu1 %774  ;;  %v2550_v45 = vpop.permute.xlu0 %772 }
 0x15c   :  { %v781_v35 = vsel %vm778_vm5, %v2546_v42, %v2550_v45 }
 0x15d   :  { %v807_v43 = vmul.f32 %v793_v22, %v781_v35  ;;  %v2284_v35 = vld [vmem:[%s2865_s7 + $0x1c] sm:$0xf] }
 0x15f   :  { %v2552_v46 = vpop.permute.xlu1 %973  ;;  %v2554_v47 = vpop.permute.xlu0 %776 }
 0x163   :  { %v2562_v51 = vpop.permute.xlu1 %977  ;;  %v2564_v52 = vpop.permute.xlu0 %975 }
 0x167   :  { %v212_v58 = vpop.permute.xlu1 %211  ;;  %v2574_v59 = vpop.permute.xlu0 %979 }
 0x168   :  { %v221_v60 = vsel %vm219_vm1, %v212_v58, %v214_v33  ;;  %v222_v61 = vsel %vm219_vm1, %v210_v34, %v212_v58  ;;  %v779_v33 = vsel %vm778_vm5, %v2548_v44, %v2554_v47  ;;  %v797_v34 = vrot.slane %v2585_v63, %v2560_v50 }
 0x169   :  { %v247_v1 = vmul.f32 %v233_v53, %v222_v61  ;;  %v248_v10 = vmul.f32 %v237_v54, %v221_v60  ;;  %v809_v41 = vmul.f32 %v801_v27, %v779_v33  ;;  %v782_v53 = vsel %vm778_vm5, %v2554_v47, %v2546_v42  ;;  %v2261_v33 = vld [vmem:[%s2860_s2 + $0xc] sm:$0xf] }
 0x16a   :  { %v982_v54 = vsel %vm981_vm6, %v2562_v51, %v2574_v59  ;;  %v984_v42 = vsel %vm981_vm6, %v2552_v46, %v2564_v52  ;;  %v992_v47 = vrot.slane %v2615_v28, %v2556_v48  ;;  %v1199_v60 = vrot.slane %v2268_v55, %v2558_v49 }
 0x16b   :  { %v2595_v16 = vpop.permute.xlu1 %1176  ;;  %2232 = vmatprep.subr.msk.mxu0 %vm255_vm2, %v247_v1  ;;  %2236 = vmatpush1.msk.msra.mxu1 %vm255_vm2, %v248_v10  ;;  %v2599_v17 = vpop.permute.xlu0 %1178  ;;  %v1207_v61 = vrot.slane %v2268_v55, %v2536_v31  ;;  %v806_v62 = vmul.f32 %v789_v36, %v782_v53  ;;  %v983_v63 = vsel %vm981_vm6, %v2564_v52, %v2562_v51  ;;  %v2253_v51 = vld [vmem:[%s2860_s2 + $0x8] sm:$0xf]  ;;  %v2269_v53 = vld [vmem:[%s2860_s2 + $0x14] sm:$0xf] }
 0x16c   :  { %2233 = vmatpush1.msk.msra.mxu0 %vm255_vm2, %v246_v12  ;;  %2237 = vmatmul.mubr.msk.f32.vlgmr.msra.gmra.mxu1 %vm251_vm4, %v250_v11  ;;  %v1012_v1 = vmul.f32 %v1004_v39, %v982_v54  ;;  %v1010_v10 = vmul.f32 %v996_v38, %v984_v42  ;;  %v1195_v52 = vrot.slane %v2268_v55, %v2556_v48 }
 0x16d   :  { %2241 = vmatprep.subr.msk.mxu1 %vm255_vm2, %v2491_v23  ;;  %2234 = vmatmul.mubr.msk.f32.vlgmr.msra.gmra.mxu0 %vm251_vm4, %v250_v11  ;;  %v2231_v23 = vld [vmem:[%s2860_s2 + $0x10] sm:$0xf]  ;;  %v985_v11 = vsel %vm981_vm6, %v2574_v59, %v2552_v46  ;;  %v1203_v46 = vrot.slane %v2268_v55, %v2560_v50  ;;  %v2276_v59 = vld [vmem:[%s2865_s7 + $0x18] sm:$0xf] }
 0x16e   :  { %2238 = vmatprep.subr.msk.mxu0 %vm255_vm2, %v2495_v24  ;;  %2242 = vmatpush1.msk.msra.mxu1 %vm255_vm2, %v2487_v19  ;;  %v1402_v21 = vrot.slane %v2276_v59, %v2558_v49  ;;  %v1410_v22 = vrot.slane %v2276_v59, %v2536_v31  ;;  %v1009_v25 = vmul.f32 %v992_v47, %v985_v11 }
 0x16f   :  { %2239 = vmatpush1.msk.msra.mxu0 %vm255_vm2, %v2485_v18  ;;  %2249 = vmatprep.subr.msk.mxu1 %vm255_vm2, %v606_v26  ;;  %v1181_v19 = vpop.permute.xlu1 %1180  ;;  %v1183_v24 = vpop.permute.xlu0 %1182  ;;  %v780_v18 = vsel %vm778_vm5, %v2550_v45, %v2548_v44  ;;  %v2245_v44 = vld [vmem:[%s2860_s2 + $0x4] sm:$0xf]  ;;  %v1000_v45 = vrot.slane %v2615_v28, %v2560_v50  ;;  %v1187_v28 = vsel %vm1184_vm7, %v2595_v16, %v2599_v17 }
 0x170   :  { %560 = vmatprep.mubr.f32.mxu1 %v2369_v0  ;;  %2246 = vmatprep.subr.msk.mxu0 %vm255_vm2, %v604_v29  ;;  %v808_v58 = vmul.f32 %v797_v34, %v780_v18  ;;  %v1188_v12 = vsel %vm1184_vm7, %v1183_v24, %v2595_v16  ;;  %v1186_v13 = vsel %vm1184_vm7, %v2599_v17, %v1181_v19 }
 0x171   :  { %489 = vmatprep.mubr.f32.mxu0 %v2369_v0  ;;  %2243 = vmatmul.mubr.msk.f32.vlgmr.msra.gmra.mxu1 %vm251_vm4, %v2231_v23  ;;  %v1011_v20 = vmul.f32 %v1000_v45, %v983_v63  ;;  %v1185_v26 = vsel %vm1184_vm7, %v1181_v19, %v1183_v24  ;;  %v1215_v27 = vmul.f32 %v1207_v61, %v1188_v12  ;;  %v2277_v63 = vld [vmem:[%s2860_s2 + $0x18] sm:$0xf] }
 0x172   :  { %2250 = vmatpush1.msk.msra.mxu1 %vm255_vm2, %v605_v37  ;;  %2240 = vmatmul.mubr.msk.f32.vlgmr.msra.gmra.mxu0 %vm251_vm4, %v2231_v23  ;;  %v1213_v29 = vmul.f32 %v1199_v60, %v1186_v13  ;;  %v1398_v23 = vrot.slane %v2276_v59, %v2556_v48  ;;  %v1406_v16 = vrot.slane %v2276_v59, %v2560_v50  ;;  %v2285_v59 = vld [vmem:[%s2860_s2 + $0x1c] sm:$0xf] }
 0x173   :  { %2247 = vmatpush1.msk.msra.mxu0 %vm255_vm2, %v603_v40  ;;  %2257 = vmatprep.subr.msk.mxu1 %vm255_vm2, %v809_v41  ;;  %v2683_v56 = vpop.permute.xlu1 %1379  ;;  %v1382_v57 = vpop.permute.xlu0 %1381  ;;  %v1214_v19 = vmul.f32 %v1203_v46, %v1185_v26  ;;  %v1605_v37 = vrot.slane %v2284_v35, %v2558_v49  ;;  %v1212_v38 = vmul.f32 %v1195_v52, %v1187_v28 }
 0x174   :  { %2254 = vmatprep.subr.msk.mxu0 %vm255_vm2, %v807_v43  ;;  %759 = vmatprep.mubr.f32.mxu1 %v2369_v0  ;;  %v1613_v40 = vrot.slane %v2284_v35, %v2536_v31  ;;  %v1390_v18 = vsel %vm1387_vm8, %v2683_v56, %v1382_v57  ;;  %v1609_v43 = vrot.slane %v2284_v35, %v2560_v50 }
 0x175   :  { %688 = vmatprep.mubr.f32.mxu0 %v2369_v0  ;;  %2251 = vmatmul.mubr.msk.f32.vlgmr.msra.gmra.mxu1 %vm251_vm4, %v2245_v44 }
 0x176   :  { %2258 = vmatpush1.msk.msra.mxu1 %vm255_vm2, %v808_v58  ;;  %2248 = vmatmul.mubr.msk.f32.vlgmr.msra.gmra.mxu0 %vm251_vm4, %v2245_v44  ;;  %v1601_v44 = vrot.slane %v2284_v35, %v2556_v48 }
 0x177   :  { %2255 = vmatpush1.msk.msra.mxu0 %vm255_vm2, %v806_v62  ;;  %2265 = vmatprep.subr.msk.mxu1 %vm255_vm2, %v1012_v1  ;;  %v1384_v14 = vpop.permute.xlu1 %1383  ;;  %v1386_v15 = vpop.permute.xlu0 %1385 }
 0x178   :  { %2262 = vmatprep.subr.msk.mxu0 %vm255_vm2, %v1010_v10  ;;  %962 = vmatprep.mubr.f32.mxu1 %v2369_v0  ;;  %v1391_v32 = vsel %vm1387_vm8, %v1386_v15, %v2683_v56  ;;  %v1389_v34 = vsel %vm1387_vm8, %v1382_v57, %v1384_v14  ;;  %v1388_v24 = vsel %vm1387_vm8, %v1384_v14, %v1386_v15  ;;  %v2292_v10 = vld [vmem:[%s2865_s7 + $0x20] sm:$0xf] }
 0x179   :  { %891 = vmatprep.mubr.f32.mxu0 %v2369_v0  ;;  %2259 = vmatmul.mubr.msk.f32.vlgmr.msra.gmra.mxu1 %vm251_vm4, %v2253_v51  ;;  %v1418_v39 = vmul.f32 %v1410_v22, %v1391_v32  ;;  %v1416_v41 = vmul.f32 %v1402_v21, %v1389_v34  ;;  %v1417_v54 = vmul.f32 %v1406_v16, %v1388_v24 }
 0x17a   :  { %2266 = vmatpush1.msk.msra.mxu1 %vm255_vm2, %v1011_v20  ;;  %2256 = vmatmul.mubr.msk.f32.vlgmr.msra.gmra.mxu0 %vm251_vm4, %v2253_v51  ;;  %v1415_v57 = vmul.f32 %v1398_v23, %v1390_v18  ;;  %v1808_v12 = vrot.slane %v2292_v10, %v2558_v49  ;;  %v1812_v52 = vrot.slane %v2292_v10, %v2560_v50 }
 0x17b   :  { %2263 = vmatpush1.msk.msra.mxu0 %vm255_vm2, %v1009_v25  ;;  %2273 = vmatprep.subr.msk.mxu1 %vm255_vm2, %v1215_v27  ;;  %v1583_v17 = vpop.permute.xlu1 %1582  ;;  %v1585_v36 = vpop.permute.xlu0 %1584  ;;  %v1816_v13 = vrot.slane %v2292_v10, %v2536_v31  ;;  %v1804_v46 = vrot.slane %v2292_v10, %v2556_v48 }
 0x17c   :  { %2270 = vmatprep.subr.msk.mxu0 %vm255_vm2, %v1213_v29  ;;  %1165 = vmatprep.mubr.f32.mxu1 %v2369_v0  ;;  %v1593_v61 = vsel %vm1590_vm9, %v1583_v17, %v1585_v36 }
 0x17d   :  { %1094 = vmatprep.mubr.f32.mxu0 %v2369_v0  ;;  %2267 = vmatmul.mubr.msk.f32.vlgmr.msra.gmra.mxu1 %vm251_vm4, %v2261_v33  ;;  %v1618_v51 = vmul.f32 %v1601_v44, %v1593_v61 }
 0x17e   :  { %2274 = vmatpush1.msk.msra.mxu1 %vm255_vm2, %v1214_v19  ;;  %2264 = vmatmul.mubr.msk.f32.vlgmr.msra.gmra.mxu0 %vm251_vm4, %v2261_v33 }
 0x17f   :  { %2271 = vmatpush1.msk.msra.mxu0 %vm255_vm2, %v1212_v38  ;;  %2281 = vmatprep.subr.msk.mxu1 %vm255_vm2, %v1418_v39  ;;  %v1587_v45 = vpop.permute.xlu1 %1586  ;;  %v1589_v42 = vpop.permute.xlu0 %1588 }
 0x180   :  { %2278 = vmatprep.subr.msk.mxu0 %vm255_vm2, %v1416_v41  ;;  %v1592_v47 = vsel %vm1590_vm9, %v1585_v36, %v1587_v45  ;;  %1368 = vmatprep.mubr.f32.mxu1 %v2369_v0  ;;  %v1591_v55 = vsel %vm1590_vm9, %v1587_v45, %v1589_v42  ;;  %v1594_v56 = vsel %vm1590_vm9, %v1589_v42, %v1583_v17 }
 0x181   :  { %v1619_v58 = vmul.f32 %v1605_v37, %v1592_v47  ;;  %v1621_v60 = vmul.f32 %v1613_v40, %v1594_v56  ;;  %1297 = vmatprep.mubr.f32.mxu0 %v2369_v0  ;;  %2275 = vmatmul.mubr.msk.f32.vlgmr.msra.gmra.mxu1 %vm251_vm4, %v2269_v53  ;;  %v1620_v62 = vmul.f32 %v1609_v43, %v1591_v55 }
 0x182   :  { %2282 = vmatpush1.msk.msra.mxu1 %vm255_vm2, %v1417_v54  ;;  %2272 = vmatmul.mubr.msk.f32.vlgmr.msra.gmra.mxu0 %vm251_vm4, %v2269_v53 }
 0x183   :  { %2279 = vmatpush1.msk.msra.mxu0 %vm255_vm2, %v1415_v57  ;;  %v1786_v1 = vpop.permute.xlu1 %1785  ;;  %1571 = vmatprep.mubr.f32.mxu1 %v2369_v0  ;;  %v1788_v11 = vpop.permute.xlu0 %1787 }
 0x184   :  { %2286 = vmatprep.subr.msk.mxu0 %vm255_vm2, %v1619_v58  ;;  %2289 = vmatprep.subr.msk.mxu1 %vm255_vm2, %v1621_v60  ;;  %v1796_v49 = vsel %vm1793_vm10, %v1786_v1, %v1788_v11 }
 0x185   :  { %1500 = vmatprep.mubr.f32.mxu0 %v2369_v0  ;;  %2283 = vmatmul.mubr.msk.f32.vlgmr.msra.gmra.mxu1 %vm251_vm4, %v2277_v63  ;;  %v1821_v25 = vmul.f32 %v1804_v46, %v1796_v49 }
 0x186   :  { %2290 = vmatpush1.msk.msra.mxu1 %vm255_vm2, %v1620_v62  ;;  %2280 = vmatmul.mubr.msk.f32.vlgmr.msra.gmra.mxu0 %vm251_vm4, %v2277_v63 }
 0x187   :  { %2287 = vmatpush1.msk.msra.mxu0 %vm255_vm2, %v1618_v51  ;;  %v1790_v14 = vpop.permute.xlu1 %1789  ;;  %1774 = vmatprep.mubr.f32.mxu1 %v2369_v0  ;;  %v1792_v50 = vpop.permute.xlu0 %1791 }
 0x188   :  { %v1795_v31 = vsel %vm1793_vm10, %v1788_v11, %v1790_v14  ;;  %v1794_v48 = vsel %vm1793_vm10, %v1790_v14, %v1792_v50  ;;  %v1797_v15 = vsel %vm1793_vm10, %v1792_v50, %v1786_v1  ;;  %1703 = vmatprep.mubr.f32.mxu0 %v2369_v0 }
 0x189   :  { %v1822_v20 = vmul.f32 %v1808_v12, %v1795_v31  ;;  %v1823_v21 = vmul.f32 %v1812_v52, %v1794_v48  ;;  %v1824_v22 = vmul.f32 %v1816_v13, %v1797_v15  ;;  %2291 = vmatmul.mubr.msk.f32.vlgmr.msra.gmra.mxu1 %vm251_vm4, %v2285_v59 }
 0x18a   :  { %2288 = vmatmul.mubr.msk.f32.vlgmr.msra.gmra.mxu0 %vm251_vm4, %v2285_v59  ;;  %1977 = vmatprep.mubr.f32.mxu1 %v2369_v0 }
 0x18b   :  { %2294 = vmatprep.subr.msk.mxu0 %vm255_vm2, %v1822_v20  ;;  %2297 = vmatprep.subr.msk.mxu1 %vm255_vm2, %v1824_v22 }
 0x18c   :  { %2295 = vmatpush1.msk.msra.mxu0 %vm255_vm2, %v1821_v25  ;;  %1906 = vmatprep.mubr.f32.mxu0 %v2369_v0 }
 0x18d   :  { %2298 = vmatpush1.msk.msra.mxu1 %vm255_vm2, %v1823_v21 }
 0x18e   :  { %2296 = vmatmul.mubr.msk.f32.vlgmr.msra.gmra.mxu0 %vm251_vm4, %v2293_v30  ;;  %2299 = vmatmul.mubr.msk.f32.vlgmr.msra.gmra.mxu1 %vm251_vm4, %v2293_v30 }
 0x18f   :  { %2098 = vmatprep.mubr.f32.mxu0 %v2369_v0  ;;  %2175 = vmatprep.mubr.f32.mxu1 %v2369_v0 }
 0x22c   :  { %v405_v26 = vpop.f32.mrf.mxu1 }
 0x22d   :  { %v334_v27 = vpop.f32.mrf.mxu0 }
 0x22e   :  { %v407_v28 = vpop.f32.mrf.mxu1 }
 0x22f   :  { %v336_v29 = vpop.f32.mrf.mxu0 }
 0x231   :  { %v562_v32 = vpop.f32.mrf.mxu1 }
 0x232   :  { %v491_v33 = vpop.f32.mrf.mxu0  ;;  %v563_v43 = vadd.f32 %v562_v32, %v405_v26 }
 0x233   :  { %v564_v23 = vpop.f32.mrf.mxu1  ;;  %v492_v53 = vadd.f32 %v491_v33, %v334_v27 }
 0x234   :  { %v493_v34 = vpop.f32.mrf.mxu0  ;;  %v565_v45 = vadd.f32 %v564_v23, %v407_v28 }
 0x235   :  { %v761_v16 = vpop.f32.mrf.mxu1  ;;  %v494_v42 = vadd.f32 %v493_v34, %v336_v29 }
 0x236   :  { %v690_v17 = vpop.f32.mrf.mxu0  ;;  %v768_v47 = vadd.f32 %v761_v16, %v563_v43 }
 0x237   :  { %v763_v35 = vpop.f32.mrf.mxu1  ;;  %v766_v55 = vadd.f32 %v690_v17, %v492_v53 }
 0x238   :  { %v692_v36 = vpop.f32.mrf.mxu0  ;;  %v769_v58 = vadd.f32 %v763_v35, %v565_v45  ;;  %v2009_v45 = vpop.permute.xlu0 %2008 }
 0x239   :  { %v964_v19 = vpop.f32.mrf.mxu1  ;;  %v767_v60 = vadd.f32 %v692_v36, %v494_v42  ;;  %v1992_v36 = vpop.permute.xlu1 %1991 }
 0x23a   :  { %v893_v24 = vpop.f32.mrf.mxu0  ;;  %v971_v61 = vadd.f32 %v964_v19, %v768_v47 }
 0x23b   :  { %v966_v37 = vpop.f32.mrf.mxu1  ;;  %v969_v62 = vadd.f32 %v893_v24, %v766_v55 }
 0x23c   :  { %v895_v38 = vpop.f32.mrf.mxu0  ;;  %v972_v10 = vadd.f32 %v966_v37, %v769_v58 }
 0x23d   :  { %v1167_v39 = vpop.f32.mrf.mxu1  ;;  %v970_v11 = vadd.f32 %v895_v38, %v767_v60 }
 0x23e   :  { %v1096_v40 = vpop.f32.mrf.mxu0  ;;  %v1174_v12 = vadd.f32 %v1167_v39, %v971_v61 }
 0x23f   :  { %v1169_v18 = vpop.f32.mrf.mxu1  ;;  %v1172_v51 = vadd.f32 %v1096_v40, %v969_v62 }
 0x240   :  { %v1098_v41 = vpop.f32.mrf.mxu0  ;;  %v1175_v46 = vadd.f32 %v1169_v18, %v972_v10  ;;  %v2014_v10 = vpop.permute.xlu1 %2013 }
 0x241   :  { %v1370_v54 = vpop.f32.mrf.mxu1  ;;  %v1173_v59 = vadd.f32 %v1098_v41, %v970_v11 }
 0x242   :  { %v1299_v44 = vpop.f32.mrf.mxu0  ;;  %v1377_v49 = vadd.f32 %v1370_v54, %v1174_v12  ;;  %v2002_v54 = vld [vmem:[%s2861_s3] sm:$0xff] }
 0x243   :  { %v1372_v56 = vpop.f32.mrf.mxu1  ;;  %v1375_v14 = vadd.f32 %v1299_v44, %v1172_v51  ;;  %v2003_v44 = vld [vmem:[%s2861_s3 + $0x8] sm:$0xff]  ;;  %s2379_s3 = smov [#allocation5]  }
 0x244   :  { %v1301_v57 = vpop.f32.mrf.mxu0  ;;  %v1378_v48 = vadd.f32 %v1372_v56, %v1175_v46  ;;  %s2217_s23 = sshll.u32 %s2379_s3, 4  ;;  %s2218_s23 = int_to_ptr.vmem [resolvable:$true] %s2217_s23 }
 0x245   :  { %v1573_v63 = vpop.f32.mrf.mxu1  ;;  %v1376_v15 = vadd.f32 %v1301_v57, %v1173_v59  ;;  %s2344_s24 = scalar_lea.vmem %s2218_s23, 1024  ;;  %p2349_p6 = scmp.lt.s32.totalorder %s2218_s23, %s2218_s23 }
 0x246   :  { %v1502_v1 = vpop.f32.mrf.mxu0  ;;  %v1580_v20 = vadd.f32 %v1573_v63, %v1377_v49  ;;  %p2345_p5 = scmp.ne.s32.totalorder %s2218_s23, %s2344_s24  ;;  %p2350_p7 = scmp.lt.s32.totalorder %s2344_s24, %s2344_s24 }
 0x247   :  { %v1575_v52 = vpop.f32.mrf.mxu1  ;;  %v1578_v21 = vadd.f32 %v1502_v1, %v1375_v14 }
 0x248   :  { %v1504_v13 = vpop.f32.mrf.mxu0  ;;  %v1581_v30 = vadd.f32 %v1575_v52, %v1378_v48  ;;  %p2351_p8 = por %p2350_p7, %p2349_p6 }
 0x249   :  { %v1776_v50 = vpop.f32.mrf.mxu1  ;;  %v1579_v26 = vadd.f32 %v1504_v13, %v1376_v15 }
 0x24a   :  { %v1705_v31 = vpop.f32.mrf.mxu0  ;;  %v1783_v27 = vadd.f32 %v1776_v50, %v1580_v20  ;;  %p2352_p9 = pnand %p2351_p8, %p2345_p5 }
 0x24b   :  { %v1778_v22 = vpop.f32.mrf.mxu1  ;;  %v1781_v28 = vadd.f32 %v1705_v31, %v1578_v21 }
 0x24c   :  { %v1707_v25 = vpop.f32.mrf.mxu0  ;;  %v1784_v33 = vadd.f32 %v1778_v22, %v1581_v30 }
 0x24d   :  { %v1782_v23 = vadd.f32 %v1707_v25, %v1579_v26 }
 0x24e   :  { %v1908_v29 = vpop.f32.mrf.mxu0  ;;  %v1979_v32 = vpop.f32.mrf.mxu1 }
 0x24f   :  { %v1984_v34 = vadd.f32 %v1908_v29, %v1781_v28  ;;  %v1986_v16 = vadd.f32 %v1979_v32, %v1783_v27 }
 0x250   :  { %v1910_v17 = vpop.f32.mrf.mxu0  ;;  %v1981_v35 = vpop.f32.mrf.mxu1 }
 0x251   :  { %v1985_v19 = vadd.f32 %v1910_v17, %v1782_v23  ;;  %v1987_v24 = vadd.f32 %v1981_v35, %v1784_v33  ;;  %v1994_v37 = vadd.f32 %v1992_v36, %v1984_v34  ;;  %v1996_v38 = vadd.f32 %v1992_v36, %v1986_v16 }
 0x253   :  { %v1995_v39 = vadd.f32 %v1992_v36, %v1985_v19  ;;  %v1997_v40 = vadd.f32 %v1992_v36, %v1987_v24  ;;  %v1998_v43 = vmax.f32 %v1994_v37, 0.0  ;;  %v2000_v53 = vmax.f32 %v1996_v38, 0.0 }
 0x255   :  { %v1999_v18 = vmax.f32 %v1995_v39, 0.0  ;;  %v2001_v41 = vmax.f32 %v1997_v40, 0.0 }
 0x257   :  { %2300 = vmatprep.subr.msk.mxu0 %vm255_vm2, %v1999_v18  ;;  %2304 = vmatprep.subr.msk.mxu1 %vm255_vm2, %v2001_v41 }
 0x258   :  { %2301 = vmatpush1.msk.msra.mxu0 %vm255_vm2, %v1998_v43  ;;  %2305 = vmatpush1.msk.msra.mxu1 %vm255_vm2, %v2000_v53 }
 0x259   :  { %2302 = vmatmul.mubr.msk.f32.vlgmr.msra.gmra.mxu0 %vm251_vm4, %v2002_v54  ;;  %2306 = vmatmul.mubr.msk.f32.vlgmr.msra.gmra.mxu1 %vm251_vm4, %v2002_v54 }
 0x25a   :  { %2104 = vmatprep.mubr.f32.mxu0 %v2369_v0  ;;  %2181 = vmatprep.mubr.f32.mxu1 %v2369_v0 }
 0x25d   :  { %2303 = vmatmul.mubr.msk.f32.gmra.mxu0 %vm251_vm4, %v2003_v44  ;;  %2307 = vmatmul.mubr.msk.f32.gmra.mxu1 %vm251_vm4, %v2003_v44 }
 0x319   :  { %v2100_v42 = vpop.f32.mrf.mxu0  ;;  %v2177_v47 = vpop.f32.mrf.mxu1 }
 0x31a   :  { %v2101_v55 = vadd.f32 %v2100_v42, %v2009_v45  ;;  %v2178_v56 = vadd.f32 %v2177_v47, %v2009_v45 }
 0x31b   :  { %v2102_v57 = vpop.f32.mrf.mxu0  ;;  %v2179_v58 = vpop.f32.mrf.mxu1 }
 0x31c   :  { %v2188_v60 = vadd.f32 %v2101_v55, %v2469_v8  ;;  %v2190_v61 = vadd.f32 %v2178_v56, %v2474_v9  ;;  %v2103_v0 = vadd.f32 %v2102_v57, %v2009_v45  ;;  %v2180_v62 = vadd.f32 %v2179_v58, %v2009_v45 }
 0x31d   :  { %v2106_v63 = vpop.f32.mrf.mxu0  ;;  %v2183_v1 = vpop.f32.mrf.mxu1 }
 0x31e   :  { %v2196_v11 = vmax.f32 %v2188_v60, 0.0  ;;  %v2198_v12 = vmax.f32 %v2190_v61, 0.0  ;;  %v2189_v51 = vadd.f32 %v2103_v0, %v2457_v6  ;;  %v2191_v52 = vadd.f32 %v2180_v62, %v2462_v7 }
 0x31f   :  { %v2107_v13 = vadd.f32 %v2106_v63, %v2014_v10  ;;  %v2184_v46 = vadd.f32 %v2183_v1, %v2014_v10  ;;  %v2108_v59 = vpop.f32.mrf.mxu0  ;;  %v2185_v49 = vpop.f32.mrf.mxu1 }
 0x320   :  { %2204 = vst [vmem:[#allocation5] sm:$0xff] %v2196_v11  ;;  %2206 = vst [vmem:[#allocation5 + $0x10] sm:$0xff] %v2198_v12  ;;  %v2197_v8 = vmax.f32 %v2189_v51, 0.0  ;;  %v2199_v14 = vmax.f32 %v2191_v52, 0.0  ;;  %v2109_v9 = vadd.f32 %v2108_v59, %v2014_v10  ;;  %v2186_v50 = vadd.f32 %v2185_v49, %v2014_v10 }
 0x321   :  { %v2192_v31 = vadd.f32 %v2107_v13, %v2445_v4  ;;  %v2194_v48 = vadd.f32 %v2184_v46, %v2452_v5 }
 0x322   :  { %2205 = vst [vmem:[#allocation5 + $0x8] sm:$0xff] %v2197_v8  ;;  %2207 = vst [vmem:[#allocation5 + $0x18] sm:$0xff] %v2199_v14  ;;  %v2193_v6 = vadd.f32 %v2109_v9, %v2435_v2  ;;  %v2195_v7 = vadd.f32 %v2186_v50, %v2440_v3 }
 0x323   :  { %v2200_v15 = vmax.f32 %v2192_v31, 0.0  ;;  %v2202_v20 = vmax.f32 %v2194_v48, 0.0 }
 0x324   :  { %v2201_v21 = vmax.f32 %v2193_v6, 0.0  ;;  %v2203_v22 = vmax.f32 %v2195_v7, 0.0 }
 0x325   :  { %2208 = vst [vmem:[#allocation5 + $0x20] sm:$0xff] %v2200_v15  ;;  %2210 = vst [vmem:[#allocation5 + $0x30] sm:$0xff] %v2202_v20 }
 0x326   :  { %2209 = vst [vmem:[#allocation5 + $0x28] sm:$0xff] %v2201_v21  ;;  %2211 = vst [vmem:[#allocation5 + $0x38] sm:$0xff] %v2203_v22 }
 0x327   :  { %2355 = shalt.err (!%p2352_p9)
}
 0x328   :  { %s2380_s25 = smov 512   ;;  %s2381_s26 = smov 32  }
 0x329   :  { %2223 = dma.vmem_to_hbm [thread:$0]  %s2218_s23, 1024, %s2866_s8, [#allocation4], %s2380_s25, %s2380_s25, %s2381_s26  }
 0x32a   :  { %2366 = dma.done.wait [#allocation4], 1024  }
 0x32b   :  { %2367 = vsyncadd [#allocation4], 4294966272 }
 0x32c   :  { %2227 = vsyncpa [#allocation3], 1 }
 0x32d   :  { %2228 = vsyncpa [#allocation4], 1 }

</bundles_post_ra>
